<compile_context>
chip_gen: v7x
topology: tpu7x:2x2x1
jax: 0.10.0
libtpu: 0.0.40
codegen_flags: <defaults>
</compile_context>

<pallas_src>
import functools

import jax
import jax.numpy as jnp
from jax import lax
from jax.experimental import pallas as pl
from jax.experimental.pallas import tpu as pltpu


def _round_up(x, m):
    return ((x + m - 1) // m) * m


def _msge_kernel(x_ref, t_ref, out_ref, acc_ref, *, H, W):
    """Fused finite-difference + squared-error + sum kernel.

    Block shapes:
      x_ref, t_ref, acc_ref : (TB, H*W)  -- TB planes, pixels on the lane axis
      out_ref               : (1, 1)     -- global sum of squared gradient diffs
    """
    i = pl.program_id(0)

    @pl.when(i == 0)
    def _():
        acc_ref[...] = jnp.zeros_like(acc_ref)

    x = x_ref[...]
    t = t_ref[...]
    TB, HW = x.shape

    # Lane-position masks for the W (fast) axis: a shift by +-1 along the
    # flattened pixel axis crosses an image-row boundary exactly where
    # wpos == W-1 / wpos == 0; those neighbours must read as zero padding.
    lane = lax.broadcasted_iota(jnp.int32, (TB, HW), 1)
    wpos = lane % W
    not_last_col = wpos != (W - 1)
    not_first_col = wpos != 0

    def shift_fwd(a, k):
        # b[:, j] = a[:, j + k], zero-filled past the end of each plane.
        s = lax.slice_in_dim(a, k, HW, axis=1)
        return jnp.concatenate([s, jnp.zeros((TB, k), a.dtype)], axis=1)

    def shift_bwd(a, k):
        # b[:, j] = a[:, j - k], zero-filled before the start of each plane.
        s = lax.slice_in_dim(a, 0, HW - k, axis=1)
        return jnp.concatenate([jnp.zeros((TB, k), a.dtype), s], axis=1)

    def central_diffs(a):
        # d/dW: neighbours at j +- 1, zeroed at image-row boundaries.
        gw = 0.5 * (jnp.where(not_last_col, shift_fwd(a, 1), 0.0)
                    - jnp.where(not_first_col, shift_bwd(a, 1), 0.0))
        # d/dH: neighbours at j +- W; the zero fill already realises the
        # top/bottom zero padding, no mask needed.
        gh = 0.5 * (shift_fwd(a, W) - shift_bwd(a, W))
        return gh, gw

    gh_x, gw_x = central_diffs(x)
    gh_t, gw_t = central_diffs(t)

    dh = gh_t - gh_x
    dw = gw_t - gw_x
    acc_ref[...] += dh * dh + dw * dw

    @pl.when(i == pl.num_programs(0) - 1)
    def _():
        out_ref[...] = jnp.sum(acc_ref[...], axis=(0, 1), keepdims=True)


def msge_loss(inputs, targets, kernel_size=3):
    """Pallas-TPU forward pass of MSGELoss for NCHW inputs/targets."""
    assert kernel_size == 3, "only the 3-tap central-difference stencil is implemented"
    assert inputs.shape == targets.shape and inputs.ndim == 4
    N, C, H, W = inputs.shape
    HW = H * W
    planes = N * C

    x = inputs.astype(jnp.float32).reshape(planes, HW)
    t = targets.astype(jnp.float32).reshape(planes, HW)

    # Tile the plane axis: blocks as large as possible (per-grid-step overhead
    # dominates for small blocks) but capped at ~2 MiB per input stream so the
    # double-buffered x/t blocks plus the scratch accumulator fit comfortably
    # in VMEM on every TPU generation (including v7x's 64 MiB).
    bytes_per_plane = HW * 4
    budget_tb = max(8, (2 * 1024 * 1024 // bytes_per_plane) // 8 * 8)
    TB = min(budget_tb, _round_up(planes, 8))
    padded_planes = _round_up(planes, TB)
    pad = padded_planes - planes
    if pad:
        # Zero planes have zero gradients and contribute nothing to the sum.
        x = jnp.pad(x, ((0, pad), (0, 0)))
        t = jnp.pad(t, ((0, pad), (0, 0)))

    grid = (padded_planes // TB,)
    tile_spec = pl.BlockSpec((TB, HW), lambda i: (i, 0))
    scalar_spec = pl.BlockSpec((1, 1), lambda i: (0, 0))

    ssq = pl.pallas_call(
        functools.partial(_msge_kernel, H=H, W=W),
        out_shape=jax.ShapeDtypeStruct((1, 1), jnp.float32),
        grid_spec=pltpu.PrefetchScalarGridSpec(
            num_scalar_prefetch=0,
            grid=grid,
            in_specs=[tile_spec, tile_spec],
            out_specs=scalar_spec,
            scratch_shapes=[pltpu.VMEM((TB, HW), jnp.float32)],
        ),
        compiler_params=pltpu.CompilerParams(
            dimension_semantics=("arbitrary",),
        ),
    )(x, t)

    # Mean over the two stacked gradient components of every voxel.
    count = 2.0 * N * C * H * W
    return ssq[0, 0] / count


def _msge_reference(inputs, targets):
    """Pure-JAX reference with the same finite-difference convention."""
    def grads(a):
        ap = jnp.pad(a, ((0, 0), (0, 0), (1, 1), (1, 1)))
        gh = 0.5 * (ap[:, :, 2:, 1:-1] - ap[:, :, :-2, 1:-1])
        gw = 0.5 * (ap[:, :, 1:-1, 2:] - ap[:, :, 1:-1, :-2])
        return jnp.stack([gh, gw], axis=2)

    d = grads(targets) - grads(inputs)
    return jnp.mean(d * d)


if __name__ == "__main__":
    key = jax.random.PRNGKey(0)
    k1, k2 = jax.random.split(key)
    # NCHW, same convention as the PyTorch module.
    inputs = jax.random.normal(k1, (2, 4, 16, 16), dtype=jnp.float32)
    targets = jax.random.normal(k2, (2, 4, 16, 16), dtype=jnp.float32)

    loss = jax.block_until_ready(msge_loss(inputs, targets))
    ref = _msge_reference(inputs, targets)

    assert jnp.isfinite(loss), "loss is not finite"
    assert jnp.allclose(loss, ref, rtol=1e-4, atol=1e-6), (loss, ref)
    print("KERNEL_OK")
</pallas_src>

<mosaic_0001>
module attributes {stable_mosaic.version = 11 : i64} {
  func.func @_msge_kernel(%arg0: i32, %arg1: memref<8x256xf32, #tpu.memory_space<vmem>>, %arg2: memref<8x256xf32, #tpu.memory_space<vmem>>, %arg3: memref<1x1xf32, #tpu.memory_space<vmem>>, %arg4: memref<8x256xf32, #tpu.memory_space<vmem>>) attributes {dimension_semantics = [#tpu.dimension_semantics<arbitrary>], iteration_bounds = array<i64: 1>, scalar_prefetch = 0 : i64, scratch_operands = 1 : i64, tpu.core_type = #tpu.core_type<tc>, window_params = [{transform_indices = @transform_0, window_bounds = array<i64: 8, 256>}, {transform_indices = @transform_1, window_bounds = array<i64: 8, 256>}, {pipeline_mode = #tpu.pipeline_mode<synchronous>, transform_indices = @transform_2, window_bounds = array<i64: 1, 1>}]} {
    %c0_i32 = arith.constant 0 : i32
    %0 = arith.cmpi eq, %arg0, %c0_i32 : i32
    %1 = arith.extui %0 : i1 to i32
    %c0_i32_0 = arith.constant 0 : i32
    %2 = arith.cmpi ne, %1, %c0_i32_0 : i32
    scf.if %2 {
      %cst_30 = arith.constant 0.000000e+00 : f32
      %81 = vector.broadcast %cst_30 : f32 to vector<8x256xf32>
      %c0_31 = arith.constant 0 : index
      %c0_32 = arith.constant 0 : index
      %82 = vector.load %arg4[%c0_31, %c0_32] : memref<8x256xf32, #tpu.memory_space<vmem>>, vector<8x256xf32>
      tpu.vector_store %arg4[%c0_31, %c0_32], %81 {strides = array<i32>} : memref<8x256xf32, #tpu.memory_space<vmem>>, vector<8x256xf32>,
    } else {
    }
    %c0 = arith.constant 0 : index
    %c0_1 = arith.constant 0 : index
    %3 = vector.load %arg1[%c0, %c0_1] : memref<8x256xf32, #tpu.memory_space<vmem>>, vector<8x256xf32>
    %c0_2 = arith.constant 0 : index
    %c0_3 = arith.constant 0 : index
    %4 = vector.load %arg2[%c0_2, %c0_3] : memref<8x256xf32, #tpu.memory_space<vmem>>, vector<8x256xf32>
    %5 = tpu.iota {dimensions = array<i32: 1>} : vector<8x256xi32>
    %c16_i32 = arith.constant 16 : i32
    %c0_i32_4 = arith.constant 0 : i32
    %6 = arith.cmpi eq, %c16_i32, %c0_i32_4 : i32
    %c1_i32 = arith.constant 1 : i32
    %7 = arith.select %6, %c1_i32, %c16_i32 : i32
    %8 = vector.broadcast %7 : i32 to vector<8x256xi32>
    %9 = arith.remsi %5, %8 : vector<8x256xi32>
    %c0_i32_5 = arith.constant 0 : i32
    %10 = vector.broadcast %c0_i32_5 : i32 to vector<8x256xi32>
    %11 = arith.cmpi ne, %9, %10 : vector<8x256xi32>
    %c0_i32_6 = arith.constant 0 : i32
    %12 = vector.broadcast %c0_i32_6 : i32 to vector<8x256xi32>
    %13 = arith.cmpi slt, %9, %12 : vector<8x256xi32>
    %c0_i32_7 = arith.constant 0 : i32
    %14 = arith.cmpi slt, %7, %c0_i32_7 : i32
    %15 = vector.broadcast %14 : i1 to vector<8x256xi1>
    %16 = vector.broadcast %15 : vector<8x256xi1> to vector<8x256xi1>
    %17 = arith.xori %13, %16 : vector<8x256xi1>
    %18 = arith.andi %17, %11 : vector<8x256xi1>
    %19 = vector.broadcast %7 : i32 to vector<8x256xi32>
    %20 = arith.addi %9, %19 : vector<8x256xi32>
    %21 = arith.select %18, %20, %9 : vector<8x256xi1>, vector<8x256xi32>
    %c15_i32 = arith.constant 15 : i32
    %22 = vector.broadcast %c15_i32 : i32 to vector<8x256xi32>
    %23 = arith.cmpi ne, %21, %22 : vector<8x256xi32>
    %c0_i32_8 = arith.constant 0 : i32
    %24 = vector.broadcast %c0_i32_8 : i32 to vector<8x256xi32>
    %25 = arith.cmpi ne, %21, %24 : vector<8x256xi32>
    %26 = vector.extract_strided_slice %3 {offsets = [0, 1], sizes = [8, 255], strides = [1, 1]} : vector<8x256xf32> to vector<8x255xf32>
    %cst = arith.constant 0.000000e+00 : f32
    %27 = vector.broadcast %cst : f32 to vector<8x1xf32>
    %28 = tpu.concatenate %26, %27 in 1 : vector<8x255xf32>, vector<8x1xf32> -> vector<8x256xf32>
    %cst_9 = arith.constant 0.000000e+00 : f32
    %29 = vector.broadcast %cst_9 : f32 to vector<8x256xf32>
    %30 = arith.select %23, %28, %29 : vector<8x256xi1>, vector<8x256xf32>
    %31 = vector.extract_strided_slice %3 {offsets = [0, 0], sizes = [8, 255], strides = [1, 1]} : vector<8x256xf32> to vector<8x255xf32>
    %cst_10 = arith.constant 0.000000e+00 : f32
    %32 = vector.broadcast %cst_10 : f32 to vector<8x1xf32>
    %33 = tpu.concatenate %32, %31 in 1 : vector<8x1xf32>, vector<8x255xf32> -> vector<8x256xf32>
    %cst_11 = arith.constant 0.000000e+00 : f32
    %34 = vector.broadcast %cst_11 : f32 to vector<8x256xf32>
    %35 = arith.select %25, %33, %34 : vector<8x256xi1>, vector<8x256xf32>
    %36 = arith.subf %30, %35 : vector<8x256xf32>
    %cst_12 = arith.constant 5.000000e-01 : f32
    %37 = vector.broadcast %cst_12 : f32 to vector<8x256xf32>
    %38 = arith.mulf %37, %36 : vector<8x256xf32>
    %39 = vector.extract_strided_slice %3 {offsets = [0, 16], sizes = [8, 240], strides = [1, 1]} : vector<8x256xf32> to vector<8x240xf32>
    %cst_13 = arith.constant 0.000000e+00 : f32
    %40 = vector.broadcast %cst_13 : f32 to vector<8x16xf32>
    %41 = tpu.concatenate %39, %40 in 1 : vector<8x240xf32>, vector<8x16xf32> -> vector<8x256xf32>
    %42 = vector.extract_strided_slice %3 {offsets = [0, 0], sizes = [8, 240], strides = [1, 1]} : vector<8x256xf32> to vector<8x240xf32>
    %cst_14 = arith.constant 0.000000e+00 : f32
    %43 = vector.broadcast %cst_14 : f32 to vector<8x16xf32>
    %44 = tpu.concatenate %43, %42 in 1 : vector<8x16xf32>, vector<8x240xf32> -> vector<8x256xf32>
    %45 = arith.subf %41, %44 : vector<8x256xf32>
    %cst_15 = arith.constant 5.000000e-01 : f32
    %46 = vector.broadcast %cst_15 : f32 to vector<8x256xf32>
    %47 = arith.mulf %46, %45 : vector<8x256xf32>
    %48 = vector.extract_strided_slice %4 {offsets = [0, 1], sizes = [8, 255], strides = [1, 1]} : vector<8x256xf32> to vector<8x255xf32>
    %cst_16 = arith.constant 0.000000e+00 : f32
    %49 = vector.broadcast %cst_16 : f32 to vector<8x1xf32>
    %50 = tpu.concatenate %48, %49 in 1 : vector<8x255xf32>, vector<8x1xf32> -> vector<8x256xf32>
    %cst_17 = arith.constant 0.000000e+00 : f32
    %51 = vector.broadcast %cst_17 : f32 to vector<8x256xf32>
    %52 = arith.select %23, %50, %51 : vector<8x256xi1>, vector<8x256xf32>
    %53 = vector.extract_strided_slice %4 {offsets = [0, 0], sizes = [8, 255], strides = [1, 1]} : vector<8x256xf32> to vector<8x255xf32>
    %cst_18 = arith.constant 0.000000e+00 : f32
    %54 = vector.broadcast %cst_18 : f32 to vector<8x1xf32>
    %55 = tpu.concatenate %54, %53 in 1 : vector<8x1xf32>, vector<8x255xf32> -> vector<8x256xf32>
    %cst_19 = arith.constant 0.000000e+00 : f32
    %56 = vector.broadcast %cst_19 : f32 to vector<8x256xf32>
    %57 = arith.select %25, %55, %56 : vector<8x256xi1>, vector<8x256xf32>
    %58 = arith.subf %52, %57 : vector<8x256xf32>
    %cst_20 = arith.constant 5.000000e-01 : f32
    %59 = vector.broadcast %cst_20 : f32 to vector<8x256xf32>
    %60 = arith.mulf %59, %58 : vector<8x256xf32>
    %61 = vector.extract_strided_slice %4 {offsets = [0, 16], sizes = [8, 240], strides = [1, 1]} : vector<8x256xf32> to vector<8x240xf32>
    %cst_21 = arith.constant 0.000000e+00 : f32
    %62 = vector.broadcast %cst_21 : f32 to vector<8x16xf32>
    %63 = tpu.concatenate %61, %62 in 1 : vector<8x240xf32>, vector<8x16xf32> -> vector<8x256xf32>
    %64 = vector.extract_strided_slice %4 {offsets = [0, 0], sizes = [8, 240], strides = [1, 1]} : vector<8x256xf32> to vector<8x240xf32>
    %cst_22 = arith.constant 0.000000e+00 : f32
    %65 = vector.broadcast %cst_22 : f32 to vector<8x16xf32>
    %66 = tpu.concatenate %65, %64 in 1 : vector<8x16xf32>, vector<8x240xf32> -> vector<8x256xf32>
    %67 = arith.subf %63, %66 : vector<8x256xf32>
    %cst_23 = arith.constant 5.000000e-01 : f32
    %68 = vector.broadcast %cst_23 : f32 to vector<8x256xf32>
    %69 = arith.mulf %68, %67 : vector<8x256xf32>
    %70 = arith.subf %69, %47 : vector<8x256xf32>
    %71 = arith.subf %60, %38 : vector<8x256xf32>
    %c0_24 = arith.constant 0 : index
    %c0_25 = arith.constant 0 : index
    %72 = vector.load %arg4[%c0_24, %c0_25] : memref<8x256xf32, #tpu.memory_space<vmem>>, vector<8x256xf32>
    %73 = arith.mulf %70, %70 : vector<8x256xf32>
    %74 = arith.mulf %71, %71 : vector<8x256xf32>
    %75 = arith.addf %73, %74 : vector<8x256xf32>
    %76 = arith.addf %72, %75 : vector<8x256xf32>
    %c0_26 = arith.constant 0 : index
    %c0_27 = arith.constant 0 : index
    %77 = vector.load %arg4[%c0_26, %c0_27] : memref<8x256xf32, #tpu.memory_space<vmem>>, vector<8x256xf32>
    tpu.vector_store %arg4[%c0_26, %c0_27], %76 {strides = array<i32>} : memref<8x256xf32, #tpu.memory_space<vmem>>, vector<8x256xf32>,
    %c0_i32_28 = arith.constant 0 : i32
    %78 = arith.cmpi eq, %arg0, %c0_i32_28 : i32
    %79 = arith.extui %78 : i1 to i32
    %c0_i32_29 = arith.constant 0 : i32
    %80 = arith.cmpi ne, %79, %c0_i32_29 : i32
    scf.if %80 {
      %c0_30 = arith.constant 0 : index
      %c0_31 = arith.constant 0 : index
      %81 = vector.load %arg4[%c0_30, %c0_31] : memref<8x256xf32, #tpu.memory_space<vmem>>, vector<8x256xf32>
      %82 = vector.shape_cast %81 : vector<8x256xf32> to vector<1x8x256xf32>
      %cst_32 = arith.constant dense<0.000000e+00> : vector<1xf32>
      %83 = vector.multi_reduction <add>, %82, %cst_32 [1, 2] : vector<1x8x256xf32> to vector<1xf32>
      %84 = vector.shape_cast %83 : vector<1xf32> to vector<1x1x1xf32>
      %85 = vector.extract %84[0, 0, 0] : f32 from vector<1x1x1xf32>
      %86 = vector.broadcast %85 : f32 to vector<1x1xf32>
      %c0_33 = arith.constant 0 : index
      %c0_34 = arith.constant 0 : index
      %87 = vector.load %arg3[%c0_33, %c0_34] : memref<1x1xf32, #tpu.memory_space<vmem>>, vector<1x1xf32>
      tpu.vector_store %arg3[%c0_33, %c0_34], %86 {strides = array<i32>} : memref<1x1xf32, #tpu.memory_space<vmem>>, vector<1x1xf32>,
    } else {
    }
    return
  }
  func.func @transform_0(%arg0: i32) -> (i32, i32) {
    %c0_i32 = arith.constant 0 : i32
    %c0_i32_0 = arith.constant 0 : i32
    return %arg0, %c0_i32 : i32, i32
  }
  func.func @transform_1(%arg0: i32) -> (i32, i32) {
    %c0_i32 = arith.constant 0 : i32
    %c0_i32_0 = arith.constant 0 : i32
    return %arg0, %c0_i32 : i32, i32
  }
  func.func @transform_2(%arg0: i32) -> (i32, i32) {
    %c0_i32 = arith.constant 0 : i32
    %c0_i32_0 = arith.constant 0 : i32
    %c0_i32_1 = arith.constant 0 : i32
    return %c0_i32, %c0_i32_0 : i32, i32
  }
}

</mosaic_0001>

<bundles_post_ra>
// kernel: tpu_custom_call.1
= control target key start
LH: loop header
LB: loop body
LE: loop exit
PB: predicated region body
PF: predicated region fallthrough
CT: control target
= control target key end

     0   :  { %7 = vsyncpa [#allocation4], 0  ;;  %s402_s0 = inlined_call_operand.hbm [shape: f32[8,256], index: 0, kind: input, shape index: {}]   ;;  %s403_s1 = inlined_call_operand.hbm [shape: f32[8,256], index: 1, kind: input, shape index: {}]   ;;  %s404_s2 = inlined_call_operand.hbm [shape: f32[1,1], index: 2, kind: output, shape index: {}]  }
   0x1   :  { %8 = vsyncpa [#allocation7], 0 }
   0x2   :  { %9 = vsyncpa [#allocation5], 0  ;;  %s304_s9 = smov [#allocation3]   ;;  %s305_s11 = smov [#allocation6]  }
   0x3   :  { %s16_s10 = sshll.u32 %s304_s9, 4  ;;  %s26_s12 = sshll.u32 %s305_s11, 4  ;;  %s17_s10 = int_to_ptr.vmem [resolvable:$true] %s16_s10  ;;  %s27_s12 = int_to_ptr.vmem [resolvable:$true] %s26_s12 }
   0x4   :  { %s232_s15 = scalar_lea.hbm %s402_s0, 256 }
   0x5   :  { %p233_p0 = scmp.ne.s32.totalorder %s402_s0, %s232_s15  ;;  %p236_p1 = scmp.lt.u32.totalorder %s232_s15, %s402_s0 }
   0x7   :  { %p238_p2 = pnand %p236_p1, %p233_p0 }
   0x9   :  { %241 = shalt.err (!%p238_p2)
}
   0xa   :  { %s242_s20 = scalar_lea.vmem %s17_s10, 256  ;;  %p247_p4 = scmp.lt.s32.totalorder %s17_s10, %s17_s10 }
   0xb   :  { %p243_p3 = scmp.ne.s32.totalorder %s17_s10, %s242_s20  ;;  %p248_p5 = scmp.lt.s32.totalorder %s242_s20, %s242_s20 }
   0xd   :  { %p249_p6 = por %p248_p5, %p247_p4 }
   0xf   :  { %p250_p7 = pnand %p249_p6, %p243_p3 }
  0x11   :  { %253 = shalt.err (!%p250_p7)
}
  0x12   :  { %19 = dma.hbm_to_vmem [thread:$0]  %s402_s0, 256, %s17_s10, [#allocation4]  }
  0x13   :  { %s254_s25 = scalar_lea.hbm %s403_s1, 256 }
  0x14   :  { %p255_p8 = scmp.ne.s32.totalorder %s403_s1, %s254_s25  ;;  %p258_p9 = scmp.lt.u32.totalorder %s254_s25, %s403_s1 }
  0x16   :  { %p260_p10 = pnand %p258_p9, %p255_p8 }
  0x18   :  { %263 = shalt.err (!%p260_p10)
}
  0x19   :  { %s264_s30 = scalar_lea.vmem %s27_s12, 256  ;;  %p269_p12 = scmp.lt.s32.totalorder %s27_s12, %s27_s12 }
  0x1a   :  { %p265_p11 = scmp.ne.s32.totalorder %s27_s12, %s264_s30  ;;  %p270_p13 = scmp.lt.s32.totalorder %s264_s30, %s264_s30 }
  0x1c   :  { %p271_p0 = por %p270_p13, %p269_p12 }
  0x1e   :  { %p272_p1 = pnand %p271_p0, %p265_p11 }
  0x20   :  { %275 = shalt.err (!%p272_p1)
}
  0x21   :  { %29 = dma.hbm_to_vmem [thread:$0]  %s403_s1, 256, %s27_s12, [#allocation7]  }
  0x22   :  { %298 = dma.done.wait [#allocation4], 256  }
  0x23   :  { %299 = vsyncadd [#allocation4], 4294967040 }
  0x24   :  { %300 = dma.done.wait [#allocation7], 256  }
  0x25   :  { %301 = vsyncadd [#allocation7], 4294967040  ;;  %v42_v0 = vld [vmem:[#allocation3] sm:$0xff]  ;;  %s306_s4 = smov 1   ;;  %s307_s5 = smov 127   ;;  %v43_v1 = vld [vmem:[#allocation3 + $0x8] sm:$0xff]  ;;  %v46_v6 = vlaneseq }
  0x26   :  { %90 = vrot.lane.b32.xlu1 %v42_v0, %s306_s4  ;;  %79 = vrot.lane.b32.xlu0 %v42_v0, %s307_s5  ;;  %v45_v2 = vld [vmem:[#allocation6 + $0x8] sm:$0xff]  ;;  %v44_v3 = vld [vmem:[#allocation6] sm:$0xff]  ;;  %s308_s6 = smov 112   ;;  %s309_s1 = smov 16   ;;  %vm83_vm0 = vcmask 1039360   ;;  %vm94_vm1 = vcmask 7168  }
  0x27   :  { %v47_v9 = vand.u32 127, %v46_v6  ;;  %vm118_vm6 = vcmask 130048   ;;  %vm109_vm7 = vcmask 916480   ;;  %s310_s7 = smov [#allocation8]   ;;  %vm205_vm8 = vcmask 0  }
  0x28   :  { %s213_s8 = sshll.u32 %s310_s7, 4  ;;  %s214_s8 = int_to_ptr.vmem [resolvable:$true] %s213_s8 }
  0x29   :  { %v48_v12 = vadd.s32 128, %v47_v9  ;;  %v53_v16 = vand.u32 15, %v47_v9  ;;  %s276_s10 = scalar_lea.vmem %s214_s8, 16  ;;  %s280_s11 = scalar_lea.vmem %s214_s8, 32 }
  0x2a   :  { %92 = vrot.lane.b32.xlu1 %v43_v1, %s306_s4  ;;  %81 = vrot.lane.b32.xlu0 %v43_v1, %s307_s5  ;;  %p277_p2 = scmp.ne.s32.totalorder %s214_s8, %s276_s10  ;;  %p281_p3 = scmp.lt.s32.totalorder %s214_s8, %s214_s8 }
  0x2b   :  { %v60_v15 = vand.u32 15, %v48_v12  ;;  %vm354_vm3 = vcmp.ne.s32.totalorder %v53_v16, 15  ;;  %vm362_vm5 = vcmp.ne.s32.totalorder %v53_v16, 0  ;;  %p282_p4 = scmp.lt.s32.totalorder %s280_s11, %s276_s10 }
  0x2d   :  { %vm350_vm2 = vcmp.ne.s32.totalorder %v60_v15, 0  ;;  %vm358_vm4 = vcmp.ne.s32.totalorder %v60_v15, 15  ;;  %p283_p5 = por %p282_p4, %p281_p3 }
  0x2e   :  { %131 = vrot.lane.b32.xlu1 %v45_v2, %s307_s5  ;;  %129 = vrot.lane.b32.xlu0 %v44_v3, %s307_s5 }
  0x2f   :  { %p284_p6 = pnand %p283_p5, %p277_p2 }
  0x32   :  { %141 = vrot.lane.b32.xlu1 %v45_v2, %s306_s4  ;;  %139 = vrot.lane.b32.xlu0 %v44_v3, %s306_s4 }
  0x36   :  { %107 = vrot.lane.b32.xlu1 %v43_v1, %s308_s6  ;;  %105 = vrot.lane.b32.xlu0 %v42_v0, %s308_s6 }
  0x3a   :  { %116 = vrot.lane.b32.xlu1 %v43_v1, %s309_s1  ;;  %114 = vrot.lane.b32.xlu0 %v42_v0, %s309_s1 }
  0x3e   :  { %155 = vrot.lane.b32.xlu1 %v45_v2, %s308_s6  ;;  %153 = vrot.lane.b32.xlu0 %v44_v3, %s308_s6 }
  0x42   :  { %163 = vrot.lane.b32.xlu1 %v45_v2, %s309_s1  ;;  %161 = vrot.lane.b32.xlu0 %v44_v3, %s309_s1 }
  0x98   :  { %v91_v4 = vpop.permute.xlu1 %90  ;;  %v80_v5 = vpop.permute.xlu0 %79 }
  0x99   :  { %v98_v30 = vsel %vm94_vm1, 0.0, %v91_v4 }
  0x9a   :  { %v99_v40 = vsel %vm362_vm5, %v98_v30, 0.0 }
  0x9c   :  { %v93_v7 = vpop.permute.xlu1 %92  ;;  %v82_v8 = vpop.permute.xlu0 %81 }
  0x9d   :  { %v95_v23 = vsel %vm94_vm1, %v91_v4, %v93_v7  ;;  %v84_v25 = vsel %vm83_vm0, %v80_v5, %v82_v8  ;;  %v87_v26 = vsel %vm83_vm0, %v82_v8, 0.0 }
  0x9e   :  { %v100_v35 = vsel %vm350_vm2, %v95_v23, 0.0  ;;  %v88_v36 = vsel %vm354_vm3, %v84_v25, 0.0  ;;  %v89_v37 = vsel %vm358_vm4, %v87_v26, 0.0 }
  0x9f   :  { %v101_v43 = vsub.f32 %v88_v36, %v99_v40  ;;  %v102_v44 = vsub.f32 %v89_v37, %v100_v35 }
  0xa0   :  { %v132_v10 = vpop.permute.xlu1 %131  ;;  %v130_v11 = vpop.permute.xlu0 %129 }
  0xa1   :  { %v136_v28 = vsel %vm83_vm0, %v132_v10, 0.0  ;;  %v133_v29 = vsel %vm83_vm0, %v130_v11, %v132_v10  ;;  %v103_v53 = vmul.f32 0.5, %v101_v43  ;;  %v104_v54 = vmul.f32 0.5, %v102_v44 }
  0xa2   :  { %v138_v38 = vsel %vm358_vm4, %v136_v28, 0.0  ;;  %v137_v39 = vsel %vm354_vm3, %v133_v29, 0.0 }
  0xa4   :  { %v142_v13 = vpop.permute.xlu1 %141  ;;  %v140_v14 = vpop.permute.xlu0 %139 }
  0xa5   :  { %v143_v21 = vsel %vm94_vm1, %v140_v14, %v142_v13  ;;  %v146_v22 = vsel %vm94_vm1, 0.0, %v140_v14 }
  0xa6   :  { %v147_v31 = vsel %vm362_vm5, %v146_v22, 0.0  ;;  %v148_v32 = vsel %vm350_vm2, %v143_v21, 0.0 }
  0xa7   :  { %v149_v41 = vsub.f32 %v137_v39, %v147_v31  ;;  %v150_v42 = vsub.f32 %v138_v38, %v148_v32 }
  0xa8   :  { %v108_v17 = vpop.permute.xlu1 %107  ;;  %v106_v18 = vpop.permute.xlu0 %105 }
  0xa9   :  { %v151_v49 = vmul.f32 0.5, %v149_v41  ;;  %v152_v50 = vmul.f32 0.5, %v150_v42  ;;  %v113_v51 = vsel %vm109_vm7, %v108_v17, 0.0  ;;  %v110_v52 = vsel %vm109_vm7, %v106_v18, %v108_v17 }
  0xab   :  { %v175_v1 = vsub.f32 %v151_v49, %v103_v53  ;;  %v176_v2 = vsub.f32 %v152_v50, %v104_v54 }
  0xac   :  { %v117_v33 = vpop.permute.xlu1 %116  ;;  %v115_v34 = vpop.permute.xlu0 %114 }
  0xad   :  { %v119_v47 = vsel %vm118_vm6, %v115_v34, %v117_v33  ;;  %v122_v48 = vsel %vm118_vm6, 0.0, %v115_v34  ;;  %v181_v11 = vmul.f32 %v175_v1, %v175_v1  ;;  %v182_v12 = vmul.f32 %v176_v2, %v176_v2 }
  0xae   :  { %v123_v55 = vsub.f32 %v110_v52, %v122_v48  ;;  %v124_v56 = vsub.f32 %v113_v51, %v119_v47 }
  0xb0   :  { %v156_v45 = vpop.permute.xlu1 %155  ;;  %v154_v46 = vpop.permute.xlu0 %153  ;;  %v125_v3 = vmul.f32 0.5, %v123_v55  ;;  %v126_v4 = vmul.f32 0.5, %v124_v56 }
  0xb1   :  { %v160_v59 = vsel %vm109_vm7, %v156_v45, 0.0  ;;  %v157_v60 = vsel %vm109_vm7, %v154_v46, %v156_v45 }
  0xb4   :  { %v164_v57 = vpop.permute.xlu1 %163  ;;  %v162_v58 = vpop.permute.xlu0 %161 }
  0xb5   :  { %v165_v61 = vsel %vm118_vm6, %v162_v58, %v164_v57  ;;  %v168_v62 = vsel %vm118_vm6, 0.0, %v162_v58 }
  0xb6   :  { %v169_v63 = vsub.f32 %v157_v60, %v168_v62  ;;  %v170_v0 = vsub.f32 %v160_v59, %v165_v61 }
  0xb8   :  { %v171_v5 = vmul.f32 0.5, %v169_v63  ;;  %v172_v6 = vmul.f32 0.5, %v170_v0 }
  0xba   :  { %v173_v7 = vsub.f32 %v171_v5, %v125_v3  ;;  %v174_v8 = vsub.f32 %v172_v6, %v126_v4 }
  0xbc   :  { %v179_v9 = vmul.f32 %v173_v7, %v173_v7  ;;  %v180_v10 = vmul.f32 %v174_v8, %v174_v8 }
  0xbe   :  { %v183_v13 = vadd.f32 %v181_v11, %v179_v9  ;;  %v184_v14 = vadd.f32 %v182_v12, %v180_v10 }
  0xc0   :  { %v194_v15 = vadd.f32 %v184_v14, %v183_v13 }
  0xc2   :  { %195 = vadd.xlane.f32.xlu0 %v194_v15 }
 0x14f   :  { %v196_v16 = vpop.xlane.xlu0 %195 }
 0x150   :  { %v197_v17 = vrot.slane %v196_v16, 4 }
 0x152   :  { %v198_v18 = vadd.f32 %v197_v17, %v196_v16 }
 0x154   :  { %v199_v19 = vrot.slane %v198_v18, 2 }
 0x156   :  { %v200_v20 = vadd.f32 %v199_v19, %v198_v18 }
 0x158   :  { %v201_v21 = vrot.slane %v200_v20, 1 }
 0x15a   :  { %v202_v22 = vadd.f32 %v201_v21, %v200_v20 }
 0x15c   :  { %223 = vpush %v202_v22 }
 0x18d   :  { %s224_s9 = spop %223 }
 0x18e   :  { %v204_v23 = vstv %s224_s9 }
 0x18f   :  { %206 = vst.msk [vmem:[#allocation8] sm:$0x1] %vm205_vm8, %v204_v23 }
 0x190   :  { %287 = shalt.err (!%p284_p6)
}
 0x191   :  { %s288_s14 = scalar_lea.hbm %s404_s2, 16 }
 0x192   :  { %p289_p7 = scmp.ne.s32.totalorder %s404_s2, %s288_s14  ;;  %p292_p8 = scmp.lt.u32.totalorder %s288_s14, %s404_s2 }
 0x194   :  { %p294_p9 = pnand %p292_p8, %p289_p7 }
 0x196   :  { %297 = shalt.err (!%p294_p9)
}
 0x197   :  { %216 = dma.vmem_to_hbm [thread:$0]  %s214_s8, 16, %s404_s2, [#allocation5]  }
 0x198   :  { %302 = dma.done.wait [#allocation5], 16  }
 0x199   :  { %303 = vsyncadd [#allocation5], 4294967280 }
 0x19a   :  { %220 = vsyncpa [#allocation4], 1 }
 0x19b   :  { %221 = vsyncpa [#allocation7], 1 }
 0x19c   :  { %222 = vsyncpa [#allocation5], 1 }

</bundles_post_ra>
